<compile_context>
chip_gen: v6e
topology: v6e:2x2x1
jax: 0.10.0
libtpu: 0.0.40
codegen_flags: <defaults>
</compile_context>

<pallas_src>
import functools

import jax
import jax.numpy as jnp
from jax import lax
from jax.experimental import pallas as pl
from jax.experimental.pallas import tpu as pltpu


def _roll_lanes(x, shift, size):
    """jnp.roll-equivalent rotate along the last (lane) axis, static shift."""
    shift = shift % size
    if shift == 0:
        return x
    return pltpu.roll(x, shift=shift, axis=1)


def _conv3x3_kernel(xc_ref, xp_ref, xn_ref, col_ref, w_ref, *rest,
                    W, M, cin, kpad, has_bias):
    """3x3 / stride-1 / pad-1 conv on one (batch, row-block) tile.

    Activations are flattened NC(HW): pixels on lanes, channels on sublanes.

    xc_ref : (cin, M)    center tile, pixels [p0, p0+M) of batch n
    xp_ref : (cin, M)    previous row-block (index clamped at j==0; masked)
    xn_ref : (cin, M)    next row-block (index clamped at j==last; masked)
    col_ref: (1, M)      per-lane column index (i % W), constant operand
    w_ref  : (cout,kpad) f32 im2col weight matrix (row k=(kh*3+kw)*cin+ci)
    b_ref  : (cout, 1)   optional bias
    o_ref  : (cout, M)   output tile
    """
    if has_bias:
        b_ref, o_ref = rest
    else:
        (o_ref,) = rest

    j = pl.program_id(1)
    nj = pl.num_programs(1)
    f32 = jnp.float32

    xc = xc_ref[...].astype(f32)
    # Neighbour tiles only ever contribute their boundary row; at the image
    # border that row must read as zero (padding=1), which is exactly
    # "zero the whole clamped neighbour tile".
    xp = jnp.where(j > 0, xp_ref[...].astype(f32), 0.0)
    xn = jnp.where(j < nj - 1, xn_ref[...].astype(f32), 0.0)

    lane = lax.broadcasted_iota(jnp.int32, (1, M), 1)
    col = col_ref[...]
    not_first_col = col != 0            # compile-time-constant masks
    not_last_col = col != W - 1

    # Vertical taps: shift the flattened plane by +-W pixels (one image row).
    # up[i]   = x[p0 + i - W]  (first W lanes come from the previous tile)
    # down[i] = x[p0 + i + W]  (last  W lanes come from the next tile)
    up = _roll_lanes(jnp.where(lane >= M - W, xp, xc), W, M)
    down = _roll_lanes(jnp.where(lane < W, xn, xc), M - W, M)

    # im2col: 9 shifted planes; lane rolls are XLU ops, masks are constants.
    taps = []
    for base in (up, xc, down):                              # kh = 0, 1, 2
        left = jnp.where(not_first_col, _roll_lanes(base, 1, M), 0.0)
        right = jnp.where(not_last_col, _roll_lanes(base, M - 1, M), 0.0)
        taps += [left, base, right]                          # kw = 0, 1, 2
    if kpad > 9 * cin:
        taps.append(jnp.zeros((kpad - 9 * cin, M), f32))
    patches = jnp.concatenate(taps, axis=0)                  # (kpad, M)

    # Single MXU contraction over all 27 taps (K padded to a multiple of 8).
    acc = jnp.dot(w_ref[...], patches,
                  preferred_element_type=f32)                # (cout, M)
    if has_bias:
        acc = acc + b_ref[...].astype(f32)
    o_ref[...] = acc.astype(o_ref.dtype)                     # lane-dense store


def _pick_block_rows(H, W, cout, kpad, itemsize=4, budget_bytes=1 << 20):
    """Largest divisor `th` of H with th*W a multiple of 128 (or th == H) whose
    per-tile working set (output + patches) stays under the budget."""
    valid = [th for th in range(1, H + 1)
             if H % th == 0 and ((th * W) % 128 == 0 or th == H)]
    per_row = (cout + kpad) * W * itemsize
    fitting = [th for th in valid if th * per_row <= budget_bytes]
    return max(fitting) if fitting else min(valid)


def overlap_patch_embed(x_nchw, weight, bias=None, *, block_rows=None):
    """PyTorch OverlapPatchEmbed.forward: Conv2d(in_c, embed_dim, 3, 1, 1)."""
    N, Cin, H, W = x_nchw.shape
    Cout = weight.shape[0]
    assert weight.shape == (Cout, Cin, 3, 3), weight.shape

    K = 9 * Cin
    Kpad = ((K + 7) // 8) * 8

    th = block_rows if block_rows is not None else _pick_block_rows(H, W, Cout, Kpad)
    assert H % th == 0, f"block_rows={th} must divide H={H}"
    M = th * W
    assert M % 128 == 0 or th == H, (
        f"block_rows*W={M} must be a multiple of 128 (or block_rows == H)")
    nj = H // th

    # Free, contiguous reshapes only -- no transposes of the activation.
    x2 = x_nchw.reshape(N, Cin, H * W)

    # im2col weight matrix: row k = (kh*3 + kw)*Cin + ci, K padded to Kpad.
    w2 = jnp.transpose(weight, (0, 2, 3, 1)).reshape(Cout, K).astype(jnp.float32)
    if Kpad != K:
        w2 = jnp.pad(w2, ((0, 0), (0, Kpad - K)))

    # Per-lane column index (same for every tile since th*W is a row multiple).
    col_ids = (jnp.arange(M, dtype=jnp.int32) % W).reshape(1, M)

    has_bias = bias is not None
    operands = [x2, x2, x2, col_ids, w2]
    in_specs = [
        pl.BlockSpec((None, Cin, M), lambda n, j: (n, 0, j)),
        pl.BlockSpec((None, Cin, M),
                     lambda n, j: (n, 0, jnp.maximum(j - 1, 0))),
        pl.BlockSpec((None, Cin, M),
                     lambda n, j: (n, 0, jnp.minimum(j + 1, nj - 1))),
        pl.BlockSpec((1, M), lambda n, j: (0, 0)),
        pl.BlockSpec((Cout, Kpad), lambda n, j: (0, 0)),
    ]
    if has_bias:
        operands.append(jnp.asarray(bias).reshape(Cout, 1).astype(jnp.float32))
        in_specs.append(pl.BlockSpec((Cout, 1), lambda n, j: (0, 0)))

    kernel = functools.partial(_conv3x3_kernel, W=W, M=M, cin=Cin,
                               kpad=Kpad, has_bias=has_bias)

    out2 = pl.pallas_call(
        kernel,
        out_shape=jax.ShapeDtypeStruct((N, Cout, H * W), x_nchw.dtype),
        grid=(N, nj),
        in_specs=in_specs,
        out_specs=pl.BlockSpec((None, Cout, M), lambda n, j: (n, 0, j)),
        compiler_params=pltpu.CompilerParams(
            # Every (n, j) step only touches its own blocks (halo comes from
            # clamped neighbour-block operands), so both axes can be sharded
            # across v7x's two TensorCores; no-op on v5e/v6e.
            dimension_semantics=("parallel", "parallel")),
    )(*operands)

    return out2.reshape(N, Cout, H, W)


if __name__ == "__main__":
    key = jax.random.PRNGKey(0)
    k_x, k_w, k_b = jax.random.split(key, 3)

    # Module defaults: in_c=3, embed_dim=48, bias=False.
    N, Cin, H, W = 2, 3, 16, 16
    Cout = 48

    x = jax.random.normal(k_x, (N, Cin, H, W), jnp.float32)
    weight = 0.1 * jax.random.normal(k_w, (Cout, Cin, 3, 3), jnp.float32)
    bias = 0.1 * jax.random.normal(k_b, (Cout,), jnp.float32)

    ref = lax.conv_general_dilated(
        x, weight, window_strides=(1, 1), padding=((1, 1), (1, 1)),
        dimension_numbers=("NCHW", "OIHW", "NCHW"))

    # 1) Module defaults (bias=False), auto row-block (single tile here).
    out = jax.block_until_ready(overlap_patch_embed(x, weight))
    assert out.shape == (N, Cout, H, W), out.shape
    err = float(jnp.max(jnp.abs(out - ref)))
    assert err < 1e-3, f"mismatch vs lax.conv reference: {err}"

    # 2) Multi-row-block tiling (exercises the halo path) + optional bias.
    out2 = jax.block_until_ready(
        overlap_patch_embed(x, weight, bias, block_rows=8))
    ref2 = ref + bias[None, :, None, None]
    err2 = float(jnp.max(jnp.abs(out2 - ref2)))
    assert err2 < 1e-3, f"mismatch vs biased reference: {err2}"

    print("KERNEL_OK")
</pallas_src>

<mosaic_0001>
module attributes {stable_mosaic.version = 11 : i64} {
  func.func @_conv3x3_kernel(%arg0: i32, %arg1: i32, %arg2: memref<1x3x256xf32, #tpu.memory_space<vmem>>, %arg3: memref<1x3x256xf32, #tpu.memory_space<vmem>>, %arg4: memref<1x3x256xf32, #tpu.memory_space<vmem>>, %arg5: memref<1x256xi32, #tpu.memory_space<vmem>>, %arg6: memref<48x32xf32, #tpu.memory_space<vmem>>, %arg7: memref<1x48x256xf32, #tpu.memory_space<vmem>>) attributes {dimension_semantics = [#tpu.dimension_semantics<parallel>, #tpu.dimension_semantics<parallel>], iteration_bounds = array<i64: 2, 1>, scalar_prefetch = 0 : i64, scratch_operands = 0 : i64, tpu.core_type = #tpu.core_type<tc>, window_params = [{transform_indices = @transform_0, window_bounds = array<i64: 1, 3, 256>}, {transform_indices = @transform_1, window_bounds = array<i64: 1, 3, 256>}, {transform_indices = @transform_2, window_bounds = array<i64: 1, 3, 256>}, {pipeline_mode = #tpu.pipeline_mode<synchronous>, transform_indices = @transform_3, window_bounds = array<i64: 1, 256>}, {pipeline_mode = #tpu.pipeline_mode<synchronous>, transform_indices = @transform_4, window_bounds = array<i64: 48, 32>}, {transform_indices = @transform_5, window_bounds = array<i64: 1, 48, 256>}]} {
    %c0 = arith.constant 0 : index
    %c0_0 = arith.constant 0 : index
    %c0_1 = arith.constant 0 : index
    %0 = vector.load %arg2[%c0, %c0_0, %c0_1] : memref<1x3x256xf32, #tpu.memory_space<vmem>>, vector<1x3x256xf32>
    %1 = vector.shape_cast %0 : vector<1x3x256xf32> to vector<3x256xf32>
    %c0_i32 = arith.constant 0 : i32
    %2 = arith.cmpi sgt, %arg1, %c0_i32 : i32
    %c0_2 = arith.constant 0 : index
    %c0_3 = arith.constant 0 : index
    %c0_4 = arith.constant 0 : index
    %3 = vector.load %arg3[%c0_2, %c0_3, %c0_4] : memref<1x3x256xf32, #tpu.memory_space<vmem>>, vector<1x3x256xf32>
    %4 = vector.shape_cast %3 : vector<1x3x256xf32> to vector<3x256xf32>
    %cst = arith.constant 0.000000e+00 : f32
    %5 = vector.broadcast %cst : f32 to vector<3x256xf32>
    %6 = arith.select %2, %4, %5 : vector<3x256xf32>
    %c0_i32_5 = arith.constant 0 : i32
    %7 = arith.cmpi slt, %arg1, %c0_i32_5 : i32
    %c0_6 = arith.constant 0 : index
    %c0_7 = arith.constant 0 : index
    %c0_8 = arith.constant 0 : index
    %8 = vector.load %arg4[%c0_6, %c0_7, %c0_8] : memref<1x3x256xf32, #tpu.memory_space<vmem>>, vector<1x3x256xf32>
    %9 = vector.shape_cast %8 : vector<1x3x256xf32> to vector<3x256xf32>
    %cst_9 = arith.constant 0.000000e+00 : f32
    %10 = vector.broadcast %cst_9 : f32 to vector<3x256xf32>
    %11 = arith.select %7, %9, %10 : vector<3x256xf32>
    %12 = tpu.iota {dimensions = array<i32: 1>} : vector<1x256xi32>
    %c0_10 = arith.constant 0 : index
    %c0_11 = arith.constant 0 : index
    %13 = vector.load %arg5[%c0_10, %c0_11] : memref<1x256xi32, #tpu.memory_space<vmem>>, vector<1x256xi32>
    %c0_i32_12 = arith.constant 0 : i32
    %14 = vector.broadcast %c0_i32_12 : i32 to vector<1x256xi32>
    %15 = arith.cmpi ne, %13, %14 : vector<1x256xi32>
    %c15_i32 = arith.constant 15 : i32
    %16 = vector.broadcast %c15_i32 : i32 to vector<1x256xi32>
    %17 = arith.cmpi ne, %13, %16 : vector<1x256xi32>
    %c240_i32 = arith.constant 240 : i32
    %18 = vector.broadcast %c240_i32 : i32 to vector<1x256xi32>
    %19 = arith.cmpi sge, %12, %18 : vector<1x256xi32>
    %20 = vector.shape_cast %19 : vector<1x256xi1> to vector<1x256xi1>
    %21 = vector.broadcast %20 : vector<1x256xi1> to vector<3x256xi1>
    %22 = arith.select %21, %6, %1 : vector<3x256xi1>, vector<3x256xf32>
    %c16_i32 = arith.constant 16 : i32
    %23 = tpu.dynamic_rotate %22 by %c16_i32 dim 1 : vector<3x256xf32>, i32 -> vector<3x256xf32>
    %c16_i32_13 = arith.constant 16 : i32
    %24 = vector.broadcast %c16_i32_13 : i32 to vector<1x256xi32>
    %25 = arith.cmpi slt, %12, %24 : vector<1x256xi32>
    %26 = vector.shape_cast %25 : vector<1x256xi1> to vector<1x256xi1>
    %27 = vector.broadcast %26 : vector<1x256xi1> to vector<3x256xi1>
    %28 = arith.select %27, %11, %1 : vector<3x256xi1>, vector<3x256xf32>
    %c240_i32_14 = arith.constant 240 : i32
    %29 = tpu.dynamic_rotate %28 by %c240_i32_14 dim 1 : vector<3x256xf32>, i32 -> vector<3x256xf32>
    %c1_i32 = arith.constant 1 : i32
    %30 = tpu.dynamic_rotate %23 by %c1_i32 dim 1 : vector<3x256xf32>, i32 -> vector<3x256xf32>
    %cst_15 = arith.constant 0.000000e+00 : f32
    %31 = vector.shape_cast %15 : vector<1x256xi1> to vector<1x256xi1>
    %32 = vector.broadcast %31 : vector<1x256xi1> to vector<3x256xi1>
    %33 = vector.broadcast %cst_15 : f32 to vector<3x256xf32>
    %34 = arith.select %32, %30, %33 : vector<3x256xi1>, vector<3x256xf32>
    %c255_i32 = arith.constant 255 : i32
    %35 = tpu.dynamic_rotate %23 by %c255_i32 dim 1 : vector<3x256xf32>, i32 -> vector<3x256xf32>
    %cst_16 = arith.constant 0.000000e+00 : f32
    %36 = vector.shape_cast %17 : vector<1x256xi1> to vector<1x256xi1>
    %37 = vector.broadcast %36 : vector<1x256xi1> to vector<3x256xi1>
    %38 = vector.broadcast %cst_16 : f32 to vector<3x256xf32>
    %39 = arith.select %37, %35, %38 : vector<3x256xi1>, vector<3x256xf32>
    %c1_i32_17 = arith.constant 1 : i32
    %40 = tpu.dynamic_rotate %1 by %c1_i32_17 dim 1 : vector<3x256xf32>, i32 -> vector<3x256xf32>
    %cst_18 = arith.constant 0.000000e+00 : f32
    %41 = vector.shape_cast %15 : vector<1x256xi1> to vector<1x256xi1>
    %42 = vector.broadcast %41 : vector<1x256xi1> to vector<3x256xi1>
    %43 = vector.broadcast %cst_18 : f32 to vector<3x256xf32>
    %44 = arith.select %42, %40, %43 : vector<3x256xi1>, vector<3x256xf32>
    %c255_i32_19 = arith.constant 255 : i32
    %45 = tpu.dynamic_rotate %1 by %c255_i32_19 dim 1 : vector<3x256xf32>, i32 -> vector<3x256xf32>
    %cst_20 = arith.constant 0.000000e+00 : f32
    %46 = vector.shape_cast %17 : vector<1x256xi1> to vector<1x256xi1>
    %47 = vector.broadcast %46 : vector<1x256xi1> to vector<3x256xi1>
    %48 = vector.broadcast %cst_20 : f32 to vector<3x256xf32>
    %49 = arith.select %47, %45, %48 : vector<3x256xi1>, vector<3x256xf32>
    %c1_i32_21 = arith.constant 1 : i32
    %50 = tpu.dynamic_rotate %29 by %c1_i32_21 dim 1 : vector<3x256xf32>, i32 -> vector<3x256xf32>
    %cst_22 = arith.constant 0.000000e+00 : f32
    %51 = vector.shape_cast %15 : vector<1x256xi1> to vector<1x256xi1>
    %52 = vector.broadcast %51 : vector<1x256xi1> to vector<3x256xi1>
    %53 = vector.broadcast %cst_22 : f32 to vector<3x256xf32>
    %54 = arith.select %52, %50, %53 : vector<3x256xi1>, vector<3x256xf32>
    %c255_i32_23 = arith.constant 255 : i32
    %55 = tpu.dynamic_rotate %29 by %c255_i32_23 dim 1 : vector<3x256xf32>, i32 -> vector<3x256xf32>
    %cst_24 = arith.constant 0.000000e+00 : f32
    %56 = vector.shape_cast %17 : vector<1x256xi1> to vector<1x256xi1>
    %57 = vector.broadcast %56 : vector<1x256xi1> to vector<3x256xi1>
    %58 = vector.broadcast %cst_24 : f32 to vector<3x256xf32>
    %59 = arith.select %57, %55, %58 : vector<3x256xi1>, vector<3x256xf32>
    %cst_25 = arith.constant 0.000000e+00 : f32
    %60 = vector.broadcast %cst_25 : f32 to vector<5x256xf32>
    %61 = tpu.concatenate %34, %23, %39, %44, %1, %49, %54, %29, %59, %60 in 0 : vector<3x256xf32>, vector<3x256xf32>, vector<3x256xf32>, vector<3x256xf32>, vector<3x256xf32>, vector<3x256xf32>, vector<3x256xf32>, vector<3x256xf32>, vector<3x256xf32>, vector<5x256xf32> -> vector<32x256xf32>
    %c0_26 = arith.constant 0 : index
    %c0_27 = arith.constant 0 : index
    %62 = vector.load %arg6[%c0_26, %c0_27] : memref<48x32xf32, #tpu.memory_space<vmem>>, vector<48x32xf32>
    %cst_28 = arith.constant dense<0.000000e+00> : vector<48x256xf32>
    %63 = tpu.matmul %62, %61, %cst_28 {dimension_numbers = #tpu.dot_dimension_numbers<[1], [0], [0], [1], [0, 0, 1, 1], [], []>} : vector<48x32xf32>, vector<32x256xf32>, vector<48x256xf32> -> vector<48x256xf32>
    %c0_29 = arith.constant 0 : index
    %c0_30 = arith.constant 0 : index
    %c0_31 = arith.constant 0 : index
    %64 = vector.load %arg7[%c0_29, %c0_30, %c0_31] : memref<1x48x256xf32, #tpu.memory_space<vmem>>, vector<1x48x256xf32>
    %65 = vector.shape_cast %64 : vector<1x48x256xf32> to vector<48x256xf32>
    %66 = vector.shape_cast %63 : vector<48x256xf32> to vector<1x48x256xf32>
    tpu.vector_store %arg7[%c0_29, %c0_30, %c0_31], %66 {strides = array<i32>} : memref<1x48x256xf32, #tpu.memory_space<vmem>>, vector<1x48x256xf32>,
    return
  }
  func.func @transform_0(%arg0: i32, %arg1: i32) -> (i32, i32, i32) {
    %c0_i32 = arith.constant 0 : i32
    %c0_i32_0 = arith.constant 0 : i32
    return %arg0, %c0_i32, %arg1 : i32, i32, i32
  }
  func.func @transform_1(%arg0: i32, %arg1: i32) -> (i32, i32, i32) {
    %c1_i32 = arith.constant 1 : i32
    %0 = arith.subi %arg1, %c1_i32 : i32
    %c0_i32 = arith.constant 0 : i32
    %1 = arith.maxsi %0, %c0_i32 : i32
    %c0_i32_0 = arith.constant 0 : i32
    %c0_i32_1 = arith.constant 0 : i32
    return %arg0, %c0_i32_0, %1 : i32, i32, i32
  }
  func.func @transform_2(%arg0: i32, %arg1: i32) -> (i32, i32, i32) {
    %c1_i32 = arith.constant 1 : i32
    %0 = arith.addi %arg1, %c1_i32 : i32
    %c0_i32 = arith.constant 0 : i32
    %1 = arith.minsi %0, %c0_i32 : i32
    %c0_i32_0 = arith.constant 0 : i32
    %c0_i32_1 = arith.constant 0 : i32
    return %arg0, %c0_i32_0, %1 : i32, i32, i32
  }
  func.func @transform_3(%arg0: i32, %arg1: i32) -> (i32, i32) {
    %c0_i32 = arith.constant 0 : i32
    %c0_i32_0 = arith.constant 0 : i32
    %c0_i32_1 = arith.constant 0 : i32
    return %c0_i32, %c0_i32_0 : i32, i32
  }
  func.func @transform_4(%arg0: i32, %arg1: i32) -> (i32, i32) {
    %c0_i32 = arith.constant 0 : i32
    %c0_i32_0 = arith.constant 0 : i32
    %c0_i32_1 = arith.constant 0 : i32
    return %c0_i32, %c0_i32_0 : i32, i32
  }
  func.func @transform_5(%arg0: i32, %arg1: i32) -> (i32, i32, i32) {
    %c0_i32 = arith.constant 0 : i32
    %c0_i32_0 = arith.constant 0 : i32
    return %arg0, %c0_i32, %arg1 : i32, i32, i32
  }
}

</mosaic_0001>

<bundles_post_ra>
// kernel: tpu_custom_call.1
= control target key start
LH: loop header
LB: loop body
LE: loop exit
PB: predicated region body
PF: predicated region fallthrough
CT: control target
= control target key end

     0   :  { %10 = vsyncpa [#allocation3], 0  ;;  %s1321_s0 = inlined_call_operand.vmem [shape: f32[2,3,256], index: 0, kind: input, shape index: {}]   ;;  %s1322_s1 = inlined_call_operand.vmem [shape: f32[2,3,256], index: 1, kind: input, shape index: {}]   ;;  %s1323_s2 = inlined_call_operand.vmem [shape: f32[2,3,256], index: 2, kind: input, shape index: {}]   ;;  %s1324_s3 = inlined_call_operand.vmem [shape: s32[1,256], index: 3, kind: input, shape index: {}]   ;;  %s1325_s4 = inlined_call_operand.vmem [shape: f32[48,32], index: 4, kind: input, shape index: {}]   ;;  %s1326_s5 = inlined_call_operand.hbm [shape: f32[2,48,256], index: 5, kind: output, shape index: {}]  }
   0x1   :  { %12 = vsyncpa [#allocation3 + $0x1], 0  ;;  %s1042_s18 = smov 0   ;;  %s1044_s19 = smov 0  }
   0x2   :  { %s1046_s20 = smov 0   ;;  %s1048_s1 = smov 0  }
   0x3   :  { %s1050_s2 = smov 0   ;;  %s1052_s21 = smov 0  }
   0x4 LB: > { %s827_s22 = sadd.s32 4294967295, %s1002_s21   ;;  %s828_s23 = sadd.s32 4294967294, %s1002_s21   ;;  %s1002_s21 = sphi %s1052_s21, %s18_s21   ;;  %s998_s2 = sphi %s1050_s2, %s1333_s2   ;;  %s994_s1 = sphi %s1048_s1, %s1332_s1   ;;  %s990_s20 = sphi %s1046_s20, %s1331_s20   ;;  %s986_s19 = sphi %s1044_s19, %s1330_s19   ;;  %s982_s18 = sphi %s1042_s18, %s1329_s18  }
   0x5   : > { %s30_s24 = sadd.s32 1, %s998_s2  ;;  %s177_s25 = sadd.s32 1, %s990_s20 }
   0x6   : > { %p32_p0 = scmp.ge.s32.totalorder %s30_s24, 2  ;;  %p187_p1 = scmp.ne.s32.totalorder %s990_s20, %s986_s19 }
   0x7   : > { %p188_p2 = scmp.eq.s32.totalorder %s827_s22, 1  ;;  %p193_p3 = scmp.ne.s32.totalorder %s986_s19, %s982_s18 }
   0x8   : > { %s1335_s24 = smov (%p32_p0, %s30_s24), 0  ;;  %p194_p5 = scmp.eq.s32.totalorder %s828_s23, 1 }
   0x9   : > { %p1082_p4 = por %p188_p2, %p187_p1  ;;  %s172_s27 = ssub.s32 %s998_s2, %s1335_s24 }
   0xa   : > { %p831_p6 = scmp.ge.s32.totalorder %s1002_s21, 1  ;;  %p175_p7 = scmp.eq.s32.totalorder %s172_s27, 0 }
   0xb   : > { %p1089_p8 = por %p194_p5, %p193_p3  ;;  %p269_p9 = scmp.lt.s32.totalorder %s1002_s21, 3 }
   0xc   : > { %s1095_s29 = scalar_select %p175_p7, %s990_s20, %s177_s25  }
   0xd   : > { %p270_p10 = pnand %p831_p6, %p269_p9 }
   0xe   : > { %p326_p11 = scmp.lt.s32.totalorder (!%p270_p10), %s994_s1, 1  ;;  %s1005_s10 = smov (!%p270_p10), 16  }
   0xf   : > { %273 = sbr.rel (%p270_p10) target bundleno = 496 (0x1f0), region = 40  ;;  %s1006_s11 = smov (!%p270_p10), 112  }
  0x10   : > { %s1007_s12 = smov (!%p270_p10), 127   ;;  %s1008_s13 = smov (!%p270_p10), 1  }
  0x11   : > { %s861_s15 = smul.u32 (!%p270_p10), 1536, %s994_s1  ;;  %s1010_s27 = smov (!%p270_p10), [#allocation2]  }
  0x13   : > { %s1269_s23 = scalar_lea.hbm (!%p270_p10), %s1326_s5, %s861_s15 }
  0x14   : > { %v381_v0 = vlaneseq  ;;  %v1004_v1 = vmov 0.0   ;;  %s327_s30 = scalar_select %p326_p11, %s994_s1, 1  ;;  %v384_v9 = vld [vmem:[%s1324_s3] sm:$0x3]  ;;  %v1009_v15 = vmov 0   ;;  %vm550_vm11 = vcmask 1041408  }
  0x15   : > { %647 = vmatprep.mubr.f32.mxu0 %v1004_v1  ;;  %665 = vmatprep.mubr.f32.mxu1 %v1004_v1  ;;  %v394_v4 = vcombine.high %v1004_v1, %v1004_v1  ;;  %vm386_vm2 = vcmp.ne.s32.totalorder %v384_v9, 15  ;;  %vm385_vm3 = vcmp.ne.s32.totalorder %v384_v9, 0  ;;  %vm553_vm12 = vcmask 1044480  }
  0x16   : > { %v1101_v2 = vand.u32 127, %v381_v0  ;;  %s849_s6 = sshll.u32 %s327_s30, 3  ;;  %v434_v10 = vshrl.u32 %v381_v0, 7  ;;  %v452_v16 = vsel %vm386_vm2, 1, %v1009_v15  ;;  %v432_v21 = vsel %vm385_vm3, 1, %v1009_v15  ;;  %s930_s30 = sshll.u32 %s1010_s27, 4  ;;  %s931_s30 = int_to_ptr.vmem [resolvable:$false] %s930_s30 }
  0x17   : > { %s333_s9 = scalar_lea.vmem %s1321_s0, %s849_s6  ;;  %vm541_vm13 = vcmask 1040384   ;;  %vm544_vm14 = vcmask 1043456   ;;  %vm535_vm15 = vcmask 1042432   ;;  %vm564_vm2 = vcmask 261120   ;;  %s932_s6 = scalar_lea.vmem %s931_s30, 3072 }
  0x18   : > { %vm405_vm0 = vcmp.lt.s32.totalorder %v1101_v2, 16  ;;  %v383_v3 = vadd.s32 128, %v1101_v2  ;;  %v1110_v5 = vld [vmem:[%s333_s9] sm:$0x77]  ;;  %v435_v12 = vsub.s32 0, %v434_v10  ;;  %v439_v13 = vsub.s32 1, %v434_v10 }
  0x19   : > { %401 = vrot.lane.b32.xlu1 %v1110_v5, %s1005_s10  ;;  %v416_v6 = vsel %vm405_vm0, 0.0, %v1110_v5  ;;  %v397_v7 = vcombine.high %v1110_v5, %v1110_v5  ;;  %vm422_vm4 = vcmp.lt.s32.totalorder %v1101_v2, 112  ;;  %vm449_vm5 = vcmp.lt.s32.totalorder %v1101_v2, 127 }
  0x1a   : > { %vm388_vm1 = vcmp.ge.s32.totalorder %v383_v3, 240  ;;  %418 = vrot.lane.b32.xlu0 %v416_v6, %s1006_s11  ;;  %v1130_v18 = vrot.slane %v452_v16, %v435_v12  ;;  %v1132_v19 = vrot.slane %v452_v16, %v439_v13  ;;  %v1139_v25 = vrot.slane %v432_v21, %v435_v12 }
  0x1b   : > { %v400_v8 = vsel %vm388_vm1, %v394_v4, %v397_v7  ;;  %v1141_v26 = vrot.slane %v432_v21, %v439_v13  ;;  %vm429_vm8 = vcmp.lt.s32.totalorder %v1101_v2, 1  ;;  %v515_v54 = vcombine.low %v1110_v5, %v1110_v5 }
  0x1c   : > { %vm461_vm6 = vcmp.eq.s32.totalorder %v1130_v18, 1  ;;  %vm462_vm7 = vcmp.eq.s32.totalorder %v1132_v19, 1  ;;  %vm441_vm9 = vcmp.eq.s32.totalorder %v1139_v25, 1  ;;  %vm538_vm1 = vcmask 1045504   ;;  %v558_v25 = vld [vmem:[%s1325_s4] sm:$0xff] }
  0x1d   : > { %403 = vrot.lane.b32.xlu1 %v400_v8, %s1005_s10  ;;  %vm442_vm10 = vcmp.eq.s32.totalorder %v1141_v26, 1  ;;  %v561_v26 = vld [vmem:[%s1325_s4 + $0x18] sm:$0xff] }
  0x1e   : > { %420 = vrot.lane.b32.xlu0 %v397_v7, %s1006_s11 }
  0x21   : > { %475 = vrot.lane.b32.xlu1 %v397_v7, %s1007_s12 }
  0x22   : > { %473 = vrot.lane.b32.xlu0 %v1110_v5, %s1007_s12 }
  0x25   : > { %467 = vrot.lane.b32.xlu1 %v397_v7, %s1008_s13 }
  0x26   : > { %465 = vrot.lane.b32.xlu0 %v1110_v5, %s1008_s13 }
  0x8b   : > { %v402_v11 = vpop.permute.xlu1 %401 }
  0x8c   : > { %v419_v14 = vpop.permute.xlu0 %418 }
  0x8f   : > { %v404_v17 = vpop.permute.xlu1 %403 }
  0x90   : > { %v421_v20 = vpop.permute.xlu0 %420  ;;  %v1145_v28 = vsel %vm405_vm0, %v404_v17, %v402_v11  ;;  %v1149_v29 = vsel %vm405_vm0, %v402_v11, %v404_v17  ;;  %vm547_vm0 = vcmask 1046528  }
  0x91   : > { %v423_v22 = vsel %vm422_vm4, %v419_v14, %v421_v20  ;;  %v424_v23 = vsel %vm422_vm4, %v421_v20, %v419_v14  ;;  %v499_v20 = vrot.slane %v1145_v28, 5  ;;  %v500_v19 = vrot.slane %v1149_v29, 5 }
  0x92   : > { %481 = vrot.lane.b32.xlu0 %v423_v22, %s1008_s13  ;;  %483 = vrot.lane.b32.xlu1 %v424_v23, %s1008_s13  ;;  %v531_v50 = vrot.slane %v423_v22, 3  ;;  %v532_v51 = vrot.slane %v424_v23, 3 }
  0x93   : > { %v476_v24 = vpop.permute.xlu1 %475 }
  0x94   : > { %v474_v27 = vpop.permute.xlu0 %473 }
  0x95   : > { %v477_v30 = vsel %vm449_vm5, %v474_v27, %v476_v24  ;;  %v478_v31 = vsel %vm449_vm5, %v476_v24, %v474_v27 }
  0x96   : > { %445 = vrot.lane.b32.xlu0 %v1145_v28, %s1007_s12  ;;  %447 = vrot.lane.b32.xlu1 %v1149_v29, %s1007_s12  ;;  %v1161_v32 = vsel %vm461_vm6, %v477_v30, 0.0  ;;  %v480_v33 = vsel %vm462_vm7, %v478_v31, 0.0  ;;  %v559_v30 = vld [vmem:[%s1325_s4 + $0x8] sm:$0xff]  ;;  %v562_v31 = vld [vmem:[%s1325_s4 + $0x20] sm:$0xff] }
  0x97   : > { %v468_v34 = vpop.permute.xlu1 %467  ;;  %v519_v46 = vrot.slane %v1161_v32, 1  ;;  %v520_v47 = vrot.slane %v480_v33, 1  ;;  %v560_v32 = vld [vmem:[%s1325_s4 + $0x10] sm:$0xff]  ;;  %v563_v33 = vld [vmem:[%s1325_s4 + $0x28] sm:$0xff] }
  0x98   : > { %v466_v35 = vpop.permute.xlu0 %465 }
  0x99   : > { %v469_v36 = vsel %vm429_vm8, %v466_v35, %v468_v34  ;;  %v470_v37 = vsel %vm429_vm8, %v468_v34, %v466_v35 }
  0x9a   : > { %489 = vrot.lane.b32.xlu0 %v423_v22, %s1007_s12  ;;  %491 = vrot.lane.b32.xlu1 %v424_v23, %s1007_s12  ;;  %v471_v38 = vsel %vm441_vm9, %v470_v37, 0.0  ;;  %v472_v39 = vsel %vm442_vm10, %v469_v36, 0.0  ;;  %s322_s12 = sand.u32 1, %s986_s19  }
  0x9b   : > { %v511_v63 = vrot.slane %v471_v38, 7  ;;  %v512_v0 = vrot.slane %v472_v39, 7  ;;  %s1275_s1 = scalar_lea.sflag [#allocation3], %s322_s12 }
  0x9e   : > { %425 = vrot.lane.b32.xlu0 %v1145_v28, %s1008_s13  ;;  %427 = vrot.lane.b32.xlu1 %v1149_v29, %s1008_s13  ;;  %s860_s13 = smul.u32 96, %s322_s12 }
  0xa0   : > { %s324_s14 = scalar_lea.vmem [#allocation2], %s860_s13 }
  0xa1   : > { %s712_s16 = sshll.u32 %s324_s14, 4  ;;  %s1271_s16 = int_to_ptr.vmem [resolvable:$true] %s712_s16 }
  0xa2   : > { %s926_s25 = scalar_lea.vmem %s1271_s16, 1536  ;;  %p933_p1 = scmp.lt.s32.totalorder %s1271_s16, %s931_s30 }
  0xa3   : > { %p927_p12 = scmp.ne.s32.totalorder %s1271_s16, %s926_s25  ;;  %p934_p2 = scmp.lt.s32.totalorder %s932_s6, %s926_s25 }
  0xa5   : > { %p928_p13 = pnand %p927_p12, %p1082_p4  ;;  %p935_p3 = por %p934_p2, %p933_p1 }
  0xa7   : > { %p929_p0 = pneg %p928_p13 }
  0xa9   : > { %p936_p5 = pnand %p935_p3, %p929_p0 }
 0x104   : > { %v482_v40 = vpop.permute.xlu0 %481  ;;  %v484_v41 = vpop.permute.xlu1 %483 }
 0x105   : > { %v485_v42 = vsel %vm429_vm8, %v482_v40, %v484_v41  ;;  %v486_v43 = vsel %vm429_vm8, %v484_v41, %v482_v40 }
 0x106   : > { %v487_v44 = vsel %vm441_vm9, %v486_v43, 0.0  ;;  %v488_v45 = vsel %vm442_vm10, %v485_v42, 0.0 }
 0x107   : > { %v525_v48 = vrot.slane %v487_v44, 6  ;;  %v526_v49 = vrot.slane %v488_v45, 6 }
 0x108   : > { %v446_v52 = vpop.permute.xlu0 %445  ;;  %v448_v53 = vpop.permute.xlu1 %447 }
 0x109   : > { %v450_v55 = vsel %vm449_vm5, %v446_v52, %v448_v53  ;;  %v451_v56 = vsel %vm449_vm5, %v448_v53, %v446_v52  ;;  %v552_v57 = vsel %vm550_vm11, %v520_v47, %v526_v49  ;;  %v551_v58 = vsel %vm550_vm11, %v519_v46, %v525_v48 }
 0x10a   : > { %v463_v59 = vsel %vm461_vm6, %v450_v55, 0.0  ;;  %v464_v60 = vsel %vm462_vm7, %v451_v56, 0.0  ;;  %v555_v61 = vsel %vm553_vm12, %v552_v57, %v532_v51  ;;  %v554_v62 = vsel %vm553_vm12, %v551_v58, %v531_v50 }
 0x10b   : > { %v505_v3 = vrot.slane %v463_v59, 2  ;;  %v506_v4 = vrot.slane %v464_v60, 2 }
 0x10c   : > { %v490_v6 = vpop.permute.xlu0 %489  ;;  %v492_v7 = vpop.permute.xlu1 %491 }
 0x10d   : > { %v493_v8 = vsel %vm449_vm5, %v490_v6, %v492_v7  ;;  %v494_v9 = vsel %vm449_vm5, %v492_v7, %v490_v6  ;;  %v543_v10 = vsel %vm541_vm13, %v506_v4, %v512_v0  ;;  %v542_v11 = vsel %vm541_vm13, %v505_v3, %v511_v63 }
 0x10e   : > { %v496_v12 = vsel %vm462_vm7, %v494_v9, 0.0  ;;  %v495_v13 = vsel %vm461_vm6, %v493_v8, 0.0  ;;  %v546_v14 = vsel %vm544_vm14, %v543_v10, %v1110_v5  ;;  %v545_v15 = vsel %vm544_vm14, %v542_v11, %v515_v54 }
 0x10f   : > { %838 = vmatprep.subr.msk.mxu0 %vm535_vm15, %v496_v12  ;;  %852 = vmatprep.subr.msk.mxu1 %vm535_vm15, %v496_v12  ;;  %v549_v16 = vsel %vm547_vm0, %v546_v14, %v520_v47  ;;  %v548_v17 = vsel %vm547_vm0, %v545_v15, %v519_v46 }
 0x110   : > { %v426_v21 = vpop.permute.xlu0 %425  ;;  %839 = vmatpush1.msk.msra.mxu0 %vm535_vm15, %v495_v13  ;;  %856 = vmatpush1.msk.msra.mxu1 %vm535_vm15, %v495_v13  ;;  %v428_v18 = vpop.permute.xlu1 %427 }
 0x111   : > { %v430_v5 = vsel %vm429_vm8, %v426_v21, %v428_v18  ;;  %v431_v22 = vsel %vm429_vm8, %v428_v18, %v426_v21  ;;  %609 = vmatprep.subr.mxu0 %v555_v61  ;;  %853 = vmatprep.subr.mxu1 %v555_v61 }
 0x112   : > { %v443_v23 = vsel %vm441_vm9, %v431_v22, 0.0  ;;  %v444_v24 = vsel %vm442_vm10, %v430_v5, 0.0  ;;  %610 = vmatpush1.msra.mxu0 %v554_v62  ;;  %857 = vmatpush1.msra.mxu1 %v554_v62 }
 0x113   : > { %611 = vmatprep.subr.mxu0 %v549_v16  ;;  %854 = vmatprep.subr.mxu1 %v549_v16  ;;  %v537_v27 = vsel %vm535_vm15, %v444_v24, %v500_v19  ;;  %v536_v28 = vsel %vm535_vm15, %v443_v23, %v499_v20 }
 0x114   : > { %612 = vmatpush1.msra.mxu0 %v548_v17  ;;  %858 = vmatpush1.msra.mxu1 %v548_v17  ;;  %v540_v2 = vsel %vm538_vm1, %v537_v27, %v506_v4  ;;  %v539_v29 = vsel %vm538_vm1, %v536_v28, %v505_v3 }
 0x115   : > { %613 = vmatprep.subr.mxu0 %v540_v2  ;;  %855 = vmatprep.subr.mxu1 %v540_v2 }
 0x116   : > { %614 = vmatpush1.msra.mxu0 %v539_v29  ;;  %859 = vmatpush1.msra.mxu1 %v539_v29 }
 0x117   : > { %840 = vmatmul.mubr.msk.f32.vlgmr.msra.gmra.mxu0 %vm564_vm2, %v558_v25  ;;  %843 = vmatmul.mubr.msk.f32.vlgmr.msra.gmra.mxu1 %vm564_vm2, %v561_v26 }
 0x118   : > { %653 = vmatprep.mubr.f32.mxu0 %v1004_v1  ;;  %671 = vmatprep.mubr.f32.mxu1 %v1004_v1 }
 0x11b   : > { %841 = vmatmul.mubr.msk.f32.gmra.mxu0 %vm564_vm2, %v559_v30  ;;  %844 = vmatmul.mubr.msk.f32.gmra.mxu1 %vm564_vm2, %v562_v31 }
 0x11c   : > { %659 = vmatprep.mubr.f32.mxu0 %v1004_v1  ;;  %677 = vmatprep.mubr.f32.mxu1 %v1004_v1 }
 0x11f   : > { %842 = vmatmul.mubr.msk.f32.gmra.mxu0 %vm564_vm2, %v560_v32  ;;  %845 = vmatmul.mubr.msk.f32.gmra.mxu1 %vm564_vm2, %v563_v33 }
 0x1d7   : > { %v649_v34 = vpop.f32.mrf.mxu0  ;;  %v667_v35 = vpop.f32.mrf.mxu1 }
 0x1d8   : > { %684 = vst [vmem:[%s324_s14] sm:$0xff] %v649_v34  ;;  %690 = vst [vmem:[%s324_s14 + $0x30] sm:$0xff] %v667_v35 }
 0x1d9   : > { %v651_v1 = vpop.f32.mrf.mxu0  ;;  %v669_v36 = vpop.f32.mrf.mxu1 }
 0x1da   : > { %685 = vst [vmem:[%s324_s14 + $0x8] sm:$0xff] %v651_v1  ;;  %691 = vst [vmem:[%s324_s14 + $0x38] sm:$0xff] %v669_v36 }
 0x1db   : > { %v655_v37 = vpop.f32.mrf.mxu0  ;;  %v673_v38 = vpop.f32.mrf.mxu1 }
 0x1dc   : > { %686 = vst [vmem:[%s324_s14 + $0x10] sm:$0xff] %v655_v37  ;;  %692 = vst [vmem:[%s324_s14 + $0x40] sm:$0xff] %v673_v38 }
 0x1dd   : > { %v657_v39 = vpop.f32.mrf.mxu0  ;;  %v675_v40 = vpop.f32.mrf.mxu1 }
 0x1de   : > { %687 = vst [vmem:[%s324_s14 + $0x18] sm:$0xff] %v657_v39  ;;  %693 = vst [vmem:[%s324_s14 + $0x48] sm:$0xff] %v675_v40 }
 0x1df   : > { %v661_v41 = vpop.f32.mrf.mxu0  ;;  %v679_v42 = vpop.f32.mrf.mxu1 }
 0x1e0   : > { %688 = vst [vmem:[%s324_s14 + $0x20] sm:$0xff] %v661_v41  ;;  %694 = vst [vmem:[%s324_s14 + $0x50] sm:$0xff] %v679_v42 }
 0x1e1   : > { %v663_v43 = vpop.f32.mrf.mxu0  ;;  %v681_v44 = vpop.f32.mrf.mxu1 }
 0x1e2   : > { %689 = vst [vmem:[%s324_s14 + $0x28] sm:$0xff] %v663_v43  ;;  %695 = vst [vmem:[%s324_s14 + $0x58] sm:$0xff] %v681_v44 }
 0x1e3   : > { %939 = shalt.err (!%p936_p5)
}
 0x1e4   : > { %s940_s7 = scalar_lea.hbm %s1269_s23, 1536  ;;  %s944_s11 = scalar_lea.hbm %s1326_s5, 3072 }
 0x1e5   : > { %p941_p6 = scmp.ne.s32.totalorder %s1269_s23, %s940_s7  ;;  %p945_p10 = scmp.lt.s32.totalorder %s1269_s23, %s1326_s5 }
 0x1e6   : > { %p946_p11 = scmp.lt.s32.totalorder %s944_s11, %s940_s7 }
 0x1e7   : > { %p942_p7 = pnand %p941_p6, %p1082_p4 }
 0x1e8   : > { %p947_p12 = por %p946_p11, %p945_p10 }
 0x1e9   : > { %p943_p9 = pneg %p942_p7 }
 0x1eb   : > { %p948_p13 = pnand %p947_p12, %p943_p9 }
 0x1ed   : > { %951 = shalt.err (!%p948_p13)
}
 0x1ee   : > { %s1011_s14 = smov 256  }
 0x1ef   : > { %862 = dma.vmem_to_hbm [thread:$0]  (%p1082_p4), %s1271_s16, 1536, %s1269_s23, %s1275_s1, %s1011_s14, %s1011_s14, %s1005_s10  }
 0x1f0 PF: > { %p868_p0 = scmp.ge.s32.totalorder %s1002_s21, 2  ;;  %s727_s15 = sand.u32 1, %s982_s18  }
 0x1f1   : > { %s728_s17 = scalar_lea.sflag [#allocation3], %s727_s15 }
 0x1f2   : > { %p865_p1 = pnand %p868_p0, %p1089_p8 }
 0x1f4   : > { %p866_p2 = pneg %p865_p1 }
 0x1f6   : > { %977 = dma.done.wait (%p866_p2), %s728_s17, 1536  }
 0x1f7   : > { %979 = vsyncadd (%p866_p2), %s728_s17, 4294965760  ;;  %s18_s21 = sadd.s32 1, %s1002_s21   ;;  %s1329_s18 = smov %s986_s19 }
 0x1f8   : > { %p15_p3 = scmp.ge.s32.totalorder %s18_s21, 4   ;;  %s1330_s19 = smov %s990_s20 }
 0x1f9   : > { %s1331_s20 = smov %s1095_s29  ;;  %s1332_s1 = smov %s998_s2 }
 0x1fa   : > { %s1333_s2 = smov %s1335_s24  ;;  %17 = sbr.rel (!%p15_p3) target bundleno = 4 (0x4), region = 81 }
 0x1ff   :  { %733 = vsyncpa [#allocation3], 1 }
 0x200   :  { %735 = vsyncpa [#allocation3 + $0x1], 1 }

</bundles_post_ra>
